<compile_context>
chip_gen: v7x
topology: tpu7x:2x2x1
jax: 0.10.0
libtpu: 0.0.40
codegen_flags: <defaults>
</compile_context>

<pallas_src>
import jax
import jax.numpy as jnp
from jax import lax
from jax.experimental import pallas as pl
from jax.experimental.pallas import tpu as pltpu


def _round_up(x, m):
    return ((x + m - 1) // m) * m


def _default_vmem_limit_bytes():
    """Generation-specific scoped-VMEM budget (best effort, safe fallback)."""
    try:
        kind = jax.devices()[0].device_kind.lower()
    except Exception:
        return None
    if "v7" in kind:                                   # 64 MiB physical VMEM
        return 48 * 1024 * 1024
    if any(t in kind for t in ("v6", "v5", "v4")):     # 128 MiB physical VMEM
        return 96 * 1024 * 1024
    return None                                        # unknown: compiler default


# ----------------------------------------------------------------------------
# Kernel: out[m, n] = sum_k p[m, k] * qT[k, n]   (= P @ Q^T, Q stored transposed)
# ----------------------------------------------------------------------------
def _matmul_nn_kernel(p_ref, qT_ref, out_ref):
    out_ref[...] = jnp.dot(
        p_ref[...], qT_ref[...], preferred_element_type=jnp.float32
    ).astype(out_ref.dtype)


# ----------------------------------------------------------------------------
# Wrapper ("the module")
# ----------------------------------------------------------------------------
class RatingModelPallas:
    def __init__(self, n_users, n_items, n_factors, key, *,
                 tile_n=16384, out_dtype=jnp.float32,
                 fastpath_max_bytes=8 * 1024 * 1024):
        k_u, k_i = jax.random.split(key)
        # nn.init.normal_(param, std=0.02) -- f32 master parameters.
        self.user_embed = (0.02 * jax.random.normal(
            k_u, (n_users, n_factors))).astype(jnp.float32)
        self.item_embed = (0.02 * jax.random.normal(
            k_i, (n_items, n_factors))).astype(jnp.float32)
        # bf16 copies used on the scoring path (MXU dtype, half HBM traffic).
        self.user_embed_bf16 = self.user_embed.astype(jnp.bfloat16)
        self.item_embed_bf16 = self.item_embed.astype(jnp.bfloat16)

        self.n_users = n_users
        self.n_items = n_items
        self.n_factors = n_factors
        self.out_dtype = out_dtype
        self.fastpath_max_bytes = fastpath_max_bytes
        self._vmem_limit = _default_vmem_limit_bytes()

        # tile_n validated to a multiple of 128; table padded at rest so the
        # grid divides exactly (no per-call padding of the big table).
        n_pad128 = _round_up(n_items, 128)
        tile_n = _round_up(max(int(tile_n), 128), 128)
        self.tile_n = min(tile_n, n_pad128)
        self.n_store = _round_up(n_pad128, self.tile_n)

        # Transposed, lane-dense, zero-padded scoring copy: (K, n_store) bf16.
        self.item_embed_bf16_T = jnp.pad(
            self.item_embed_bf16.T, ((0, 0), (0, self.n_store - n_items)))

    # -- single-block matmul (fast path / given-items branch) -----------------
    def _single_block_matmul(self, p_u, qT):
        m_pad, k = p_u.shape
        n_pad = qT.shape[1]
        out_isize = jnp.dtype(self.out_dtype).itemsize
        cost = pl.CostEstimate(
            flops=2 * m_pad * n_pad * k,
            transcendentals=0,
            bytes_accessed=p_u.size * 2 + qT.size * 2 + m_pad * n_pad * out_isize)
        return pl.pallas_call(
            _matmul_nn_kernel,
            out_shape=jax.ShapeDtypeStruct((m_pad, n_pad), self.out_dtype),
            in_specs=[pl.BlockSpec(memory_space=pltpu.MemorySpace.VMEM)] * 2,
            out_specs=pl.BlockSpec(memory_space=pltpu.MemorySpace.VMEM),
            compiler_params=pltpu.CompilerParams(
                vmem_limit_bytes=self._vmem_limit),
            cost_estimate=cost,
        )(p_u, qT)

    # -- all-items branch: stream the HBM-resident (K, n_store) item table ----
    def _score_all_items(self, p_u):
        m_pad, k = p_u.shape
        qT = self.item_embed_bf16_T
        n_store, tile_n = self.n_store, self.tile_n
        out_isize = jnp.dtype(self.out_dtype).itemsize

        # Small-catalog fast path: everything fits comfortably in VMEM ->
        # single block, no grid, no per-step pipeline overhead.
        footprint = qT.size * 2 + m_pad * n_store * out_isize + p_u.size * 2
        if footprint <= self.fastpath_max_bytes:
            return self._single_block_matmul(p_u, qT)[:, :self.n_items]

        cost = pl.CostEstimate(
            flops=2 * m_pad * n_store * k,
            transcendentals=0,
            bytes_accessed=p_u.size * 2 + qT.size * 2 + m_pad * n_store * out_isize)

        out = pl.pallas_call(
            _matmul_nn_kernel,
            out_shape=jax.ShapeDtypeStruct((m_pad, n_store), self.out_dtype),
            grid_spec=pltpu.PrefetchScalarGridSpec(
                num_scalar_prefetch=0,
                grid=(n_store // tile_n,),
                in_specs=[
                    # P_u: identical block every step -> DMA'd once, VMEM-resident.
                    pl.BlockSpec((m_pad, k), lambda j: (0, 0)),
                    # Item table (transposed): lane-dense (K, tile_n) blocks,
                    # streamed and auto double-buffered.
                    pl.BlockSpec((k, tile_n), lambda j: (0, j)),
                ],
                out_specs=pl.BlockSpec((m_pad, tile_n), lambda j: (0, j)),
            ),
            compiler_params=pltpu.CompilerParams(
                # Parallel item-tile axis -> sharded across the 2 TCs on v7x.
                # TODO(synk): if measured as a no-op on v7x, switch this axis to
                # pltpu.CORE_PARALLEL or an explicit per-core split (pattern P9).
                dimension_semantics=("parallel",),
                vmem_limit_bytes=self._vmem_limit,
            ),
            cost_estimate=cost,
        )(p_u, qT)
        return out[:, :self.n_items]

    # -- given-items branch: tiny lane-dense matmul on gathered rows ----------
    def _score_given_items(self, p_u, item_id):
        nb = item_id.shape[0]
        n_pad = _round_up(nb, 128)                    # lane-dense output stores
        q_i = self.item_embed_bf16[item_id]           # XLA HBM row gather (nb, K)
        q_i = jnp.pad(q_i, ((0, n_pad - nb), (0, 0)))
        qT = q_i.T                                    # (K, n_pad) lane-dense rhs
        return self._single_block_matmul(p_u, qT)[:, :nb]

    def forward(self, user_id, item_id=None):
        user_id = jnp.clip(user_id.astype(jnp.int32), 0, self.n_users - 1)
        batch = user_id.shape[0]
        # Pad query rows to a bf16-sublane multiple.  For throughput, stack
        # several request batches per call so the effective M reaches >=128.
        m_pad = _round_up(batch, 16)
        p_u = self.user_embed_bf16[user_id]           # XLA HBM row gather, (B, K)
        if m_pad != batch:
            p_u = jnp.pad(p_u, ((0, m_pad - batch), (0, 0)))

        if item_id is None:
            scores = self._score_all_items(p_u)
        else:
            item_id = jnp.clip(item_id.astype(jnp.int32), 0, self.n_items - 1)
            scores = self._score_given_items(p_u, item_id)
        return scores[:batch]

    __call__ = forward


# ----------------------------------------------------------------------------
# Demo / check
# ----------------------------------------------------------------------------
if __name__ == "__main__":
    n_users, n_items, n_factors, batch = 64, 1024, 32, 8

    key = jax.random.PRNGKey(0)
    k_model, k_uid, k_iid = jax.random.split(key, 3)

    # Default model: small catalog -> fast path (single-block kernel).
    model = RatingModelPallas(n_users, n_items, n_factors, k_model)
    # Same weights, but force the streamed-grid path (tile_n=256 -> 4 tiles)
    # so the pipelined code path is also exercised at demo sizes.
    model_grid = RatingModelPallas(n_users, n_items, n_factors, k_model,
                                   tile_n=256, fastpath_max_bytes=0)

    user_id = jax.random.randint(k_uid, (batch,), 0, n_users, dtype=jnp.int32)
    item_id = jax.random.randint(k_iid, (batch,), 0, n_items, dtype=jnp.int32)

    # Branch 1: score against all items -> (batch, n_items)
    scores_all = jax.block_until_ready(model(user_id))            # fast path
    scores_all_grid = jax.block_until_ready(model_grid(user_id))  # streamed path
    # Branch 2: score against given items -> (batch, batch)
    scores_pair = jax.block_until_ready(model(user_id, item_id))

    # Pure-JAX reference using the same bf16 operand cast (f32 accumulation).
    p_ref = model.user_embed_bf16[user_id].astype(jnp.float32)
    q_all = model.item_embed_bf16.astype(jnp.float32)
    q_sel = model.item_embed_bf16[item_id].astype(jnp.float32)
    ref_all = jnp.dot(p_ref, q_all.T, precision=lax.Precision.HIGHEST)
    ref_pair = jnp.dot(p_ref, q_sel.T, precision=lax.Precision.HIGHEST)

    assert scores_all.shape == (batch, n_items)
    assert scores_all_grid.shape == (batch, n_items)
    assert scores_pair.shape == (batch, batch)
    assert jnp.allclose(scores_all, ref_all, atol=1e-5, rtol=1e-3)
    assert jnp.allclose(scores_all_grid, ref_all, atol=1e-5, rtol=1e-3)
    assert jnp.allclose(scores_pair, ref_pair, atol=1e-5, rtol=1e-3)

    print("KERNEL_OK")
</pallas_src>

<mosaic_0001>
module attributes {stable_mosaic.version = 11 : i64} {
  func.func @_matmul_nn_kernel(%arg0: memref<16x32xbf16, #tpu.memory_space<vmem>>, %arg1: memref<32x1024xbf16, #tpu.memory_space<vmem>>, %arg2: memref<16x1024xf32, #tpu.memory_space<vmem>>) attributes {dimension_semantics = [], scalar_prefetch = 0 : i64, scratch_operands = 0 : i64, tpu.core_type = #tpu.core_type<tc>} {
    %c0 = arith.constant 0 : index
    %c0_0 = arith.constant 0 : index
    %0 = vector.load %arg0[%c0, %c0_0] : memref<16x32xbf16, #tpu.memory_space<vmem>>, vector<16x32xbf16>
    %c0_1 = arith.constant 0 : index
    %c0_2 = arith.constant 0 : index
    %1 = vector.load %arg1[%c0_1, %c0_2] : memref<32x1024xbf16, #tpu.memory_space<vmem>>, vector<32x1024xbf16>
    %cst = arith.constant dense<0.000000e+00> : vector<16x1024xf32>
    %2 = tpu.matmul %0, %1, %cst {dimension_numbers = #tpu.dot_dimension_numbers<[1], [0], [0], [1], [0, 0, 1, 1], [], []>} : vector<16x32xbf16>, vector<32x1024xbf16>, vector<16x1024xf32> -> vector<16x1024xf32>
    %c0_3 = arith.constant 0 : index
    %c0_4 = arith.constant 0 : index
    %3 = vector.load %arg2[%c0_3, %c0_4] : memref<16x1024xf32, #tpu.memory_space<vmem>>, vector<16x1024xf32>
    tpu.vector_store %arg2[%c0_3, %c0_4], %2 {strides = array<i32>} : memref<16x1024xf32, #tpu.memory_space<vmem>>, vector<16x1024xf32>,
    return
  }
}

</mosaic_0001>

<bundles_post_ra>
// kernel: tpu_custom_call.1
= control target key start
LH: loop header
LB: loop body
LE: loop exit
PB: predicated region body
PF: predicated region fallthrough
CT: control target
= control target key end

     0   :  { %7 = vsyncpa [#allocation3], 0  ;;  %s524_s0 = inlined_call_operand.hbm [shape: bf16[16,32], index: 0, kind: input, shape index: {}]   ;;  %s525_s1 = inlined_call_operand.hbm [shape: bf16[32,1024], index: 1, kind: input, shape index: {}]   ;;  %s526_s2 = inlined_call_operand.hbm [shape: f32[16,1024], index: 2, kind: output, shape index: {}]  }
   0x1   :  { %8 = vsyncpa [#allocation6], 0 }
   0x2   :  { %9 = vsyncpa [#allocation4], 0  ;;  %s457_s9 = smov [#allocation2]   ;;  %s385_s13 = scalar_lea.hbm %s524_s0, 128 }
   0x3   :  { %s15_s10 = sshll.u32 %s457_s9, 4  ;;  %p386_p0 = scmp.ne.s32.totalorder %s524_s0, %s385_s13  ;;  %s16_s10 = int_to_ptr.vmem [resolvable:$true] %s15_s10 }
   0x4   :  { %p389_p1 = scmp.lt.u32.totalorder %s385_s13, %s524_s0 }
   0x6   :  { %p391_p2 = pnand %p389_p1, %p386_p0 }
   0x8   :  { %394 = shalt.err (!%p391_p2)
}
   0x9   :  { %s395_s18 = scalar_lea.vmem %s16_s10, 128  ;;  %p400_p4 = scmp.lt.s32.totalorder %s16_s10, %s16_s10 }
   0xa   :  { %p396_p3 = scmp.ne.s32.totalorder %s16_s10, %s395_s18  ;;  %p401_p5 = scmp.lt.s32.totalorder %s395_s18, %s395_s18 }
   0xc   :  { %p402_p6 = por %p401_p5, %p400_p4 }
   0xe   :  { %p403_p7 = pnand %p402_p6, %p396_p3 }
  0x10   :  { %406 = shalt.err (!%p403_p7)
}
  0x11   :  { %s458_s19 = smov 64   ;;  %s459_s20 = smov 4  }
  0x12   :  { %21 = dma.hbm_to_vmem [thread:$0]  %s524_s0, 128, %s16_s10, [#allocation3], %s458_s19, %s458_s19, %s459_s20  }
  0x13   :  { %s460_s23 = smov [#allocation5]   ;;  %s407_s27 = scalar_lea.hbm %s525_s1, 2048 }
  0x14   :  { %s27_s24 = sshll.u32 %s460_s23, 4  ;;  %p408_p8 = scmp.ne.s32.totalorder %s525_s1, %s407_s27  ;;  %s28_s24 = int_to_ptr.vmem [resolvable:$true] %s27_s24 }
  0x15   :  { %p411_p9 = scmp.lt.u32.totalorder %s407_s27, %s525_s1 }
  0x17   :  { %p413_p10 = pnand %p411_p9, %p408_p8 }
  0x19   :  { %416 = shalt.err (!%p413_p10)
}
  0x1a   :  { %s417_s4 = scalar_lea.vmem %s28_s24, 2048  ;;  %p422_p12 = scmp.lt.s32.totalorder %s28_s24, %s28_s24 }
  0x1b   :  { %p418_p11 = scmp.ne.s32.totalorder %s28_s24, %s417_s4  ;;  %p423_p13 = scmp.lt.s32.totalorder %s417_s4, %s417_s4 }
  0x1d   :  { %p424_p0 = por %p423_p13, %p422_p12 }
  0x1f   :  { %p425_p1 = pnand %p424_p0, %p418_p11 }
  0x21   :  { %428 = shalt.err (!%p425_p1)
}
  0x22   :  { %s461_s0 = smov 512   ;;  %s462_s5 = smov 32  }
  0x23   :  { %33 = dma.hbm_to_vmem [thread:$0]  %s525_s1, 2048, %s28_s24, [#allocation6], %s461_s0, %s461_s0, %s462_s5  }
  0x24   :  { %451 = dma.done.wait [#allocation3], 128  }
  0x25   :  { %452 = vsyncadd [#allocation3], 4294967168 }
  0x26   :  { %453 = dma.done.wait [#allocation6], 2048  }
  0x27   :  { %454 = vsyncadd [#allocation6], 4294965248  ;;  %v463_v0 = vmov 0   ;;  %v43_v1 = vld [vmem:[#allocation5] sm:$0xff]  ;;  %v44_v3 = vld [vmem:[#allocation5 + $0x8] sm:$0xff]  ;;  %vm144_vm0 = vcmask 261120  }
  0x28   :  { %180 = vmatprep.mubr.bf16.mxu0 %v463_v0  ;;  %223 = vmatprep.mubr.bf16.mxu1 %v463_v0  ;;  %v47_v2 = vld [vmem:[#allocation5 + $0x20] sm:$0xff]  ;;  %v48_v5 = vld [vmem:[#allocation5 + $0x28] sm:$0xff]  ;;  %v45_v15 = vld [vmem:[#allocation5 + $0x10] sm:$0xff]  ;;  %s464_s1 = smov [#allocation7]  }
  0x29   :  { %v356_v4 = vcombine.high %v43_v1, %v47_v2  ;;  %v355_v6 = vcombine.low %v43_v1, %v47_v2  ;;  %v51_v7 = vld [vmem:[#allocation5 + $0x40] sm:$0xff]  ;;  %v358_v9 = vcombine.high %v44_v3, %v48_v5  ;;  %v357_v10 = vcombine.low %v44_v3, %v48_v5  ;;  %v52_v12 = vld [vmem:[#allocation5 + $0x48] sm:$0xff]  ;;  %v49_v17 = vld [vmem:[#allocation5 + $0x30] sm:$0xff]  ;;  %s341_s8 = sshll.u32 %s464_s1, 4  ;;  %s342_s8 = int_to_ptr.vmem [resolvable:$true] %s341_s8 }
  0x2a   :  { %v55_v8 = vld [vmem:[#allocation5 + $0x60] sm:$0xff]  ;;  %v56_v13 = vld [vmem:[#allocation5 + $0x68] sm:$0xff]  ;;  %v46_v18 = vld [vmem:[#allocation5 + $0x18] sm:$0xff]  ;;  %v360_v21 = vcombine.high %v45_v15, %v49_v17  ;;  %v359_v28 = vcombine.low %v45_v15, %v49_v17  ;;  %s429_s9 = scalar_lea.vmem %s342_s8, 2048  ;;  %p434_p3 = scmp.lt.s32.totalorder %s342_s8, %s342_s8 }
  0x2b   :  { %v364_v11 = vcombine.high %v51_v7, %v55_v8  ;;  %148 = vmatprep.subr.bf16.mxu0 %v356_v4  ;;  %v366_v14 = vcombine.high %v52_v12, %v56_v13  ;;  %191 = vmatprep.subr.bf16.mxu1 %v358_v9  ;;  %v363_v16 = vcombine.low %v51_v7, %v55_v8  ;;  %v50_v19 = vld [vmem:[#allocation5 + $0x38] sm:$0xff]  ;;  %v53_v23 = vld [vmem:[#allocation5 + $0x50] sm:$0xff]  ;;  %p430_p2 = scmp.ne.s32.totalorder %s342_s8, %s429_s9  ;;  %p435_p4 = scmp.lt.s32.totalorder %s429_s9, %s429_s9 }
  0x2c   :  { %149 = vmatpush1.bf16.msra.mxu0 %v355_v6  ;;  %192 = vmatpush1.bf16.msra.mxu1 %v357_v10  ;;  %v365_v20 = vcombine.low %v52_v12, %v56_v13  ;;  %v362_v22 = vcombine.high %v46_v18, %v50_v19  ;;  %v57_v24 = vld [vmem:[#allocation5 + $0x70] sm:$0xff]  ;;  %v384_v25 = vld [vmem:[#allocation2] sm:$0xff]   ;;  %v361_v29 = vcombine.low %v46_v18, %v50_v19 }
  0x2d   :  { %150 = vmatprep.subr.bf16.mxu0 %v364_v11  ;;  %193 = vmatprep.subr.bf16.mxu1 %v366_v14  ;;  %v54_v26 = vld [vmem:[#allocation5 + $0x58] sm:$0xff]  ;;  %v368_v30 = vcombine.high %v53_v23, %v57_v24  ;;  %v367_v32 = vcombine.low %v53_v23, %v57_v24  ;;  %p436_p5 = por %p435_p4, %p434_p3 }
  0x2e   :  { %v58_v27 = vld [vmem:[#allocation5 + $0x78] sm:$0xff] }
  0x2f   :  { %v370_v31 = vcombine.high %v54_v26, %v58_v27  ;;  %v369_v33 = vcombine.low %v54_v26, %v58_v27  ;;  %p437_p6 = pnand %p436_p5, %p430_p2 }
  0x30   :  { %151 = vmatpush1.bf16.msra.mxu0 %v363_v16  ;;  %194 = vmatpush1.bf16.msra.mxu1 %v365_v20 }
  0x31   :  { %234 = vmatprep.subr.bf16.mxu0 %v360_v21  ;;  %277 = vmatprep.subr.bf16.mxu1 %v362_v22 }
  0x33   :  { %371 = vmatmul.mubr.msk.bf16.vlgmr.msra.gmra.mrb[0].mxu0 %vm144_vm0, %v384_v25  ;;  %372 = vmatmul.mubr.msk.bf16.vlgmr.msra.gmra.mrb[0].mxu1 %vm144_vm0, %v384_v25 }
  0x34   :  { %235 = vmatpush1.bf16.msra.mxu0 %v359_v28  ;;  %278 = vmatpush1.bf16.msra.mxu1 %v361_v29 }
  0x35   :  { %236 = vmatprep.subr.bf16.mxu0 %v368_v30  ;;  %279 = vmatprep.subr.bf16.mxu1 %v370_v31 }
  0x36   :  { %266 = vmatprep.mubr.bf16.mxu0 %v463_v0  ;;  %309 = vmatprep.mubr.bf16.mxu1 %v463_v0 }
  0x38   :  { %237 = vmatpush1.bf16.msra.mxu0 %v367_v32  ;;  %280 = vmatpush1.bf16.msra.mxu1 %v369_v33 }
  0x3b   :  { %373 = vmatmul.mubr.msk.bf16.vlgmr.msra.gmra.mrb[4].mxu0 %vm144_vm0, %v384_v25  ;;  %374 = vmatmul.mubr.msk.bf16.vlgmr.msra.gmra.mrb[4].mxu1 %vm144_vm0, %v384_v25 }
 0x106   :  { %v182_v34 = vpop.f32.mrb[0].mxu0  ;;  %v225_v35 = vpop.f32.mrb[0].mxu1 }
 0x107   :  { %320 = vst [vmem:[#allocation7] sm:$0xff] %v182_v34  ;;  %v184_v36 = vpop.f32.mrb[1].mxu0  ;;  %322 = vst [vmem:[#allocation7 + $0x10] sm:$0xff] %v225_v35  ;;  %v227_v37 = vpop.f32.mrb[1].mxu1 }
 0x108   :  { %321 = vst [vmem:[#allocation7 + $0x8] sm:$0xff] %v184_v36  ;;  %v186_v38 = vpop.f32.mrb[2].mxu0  ;;  %323 = vst [vmem:[#allocation7 + $0x18] sm:$0xff] %v227_v37  ;;  %v229_v39 = vpop.f32.mrb[2].mxu1 }
 0x109   :  { %328 = vst [vmem:[#allocation7 + $0x40] sm:$0xff] %v186_v38  ;;  %v188_v40 = vpop.f32.mrb[3].mxu0  ;;  %330 = vst [vmem:[#allocation7 + $0x50] sm:$0xff] %v229_v39  ;;  %v231_v41 = vpop.f32.mrb[3].mxu1 }
 0x10a   :  { %329 = vst [vmem:[#allocation7 + $0x48] sm:$0xff] %v188_v40  ;;  %331 = vst [vmem:[#allocation7 + $0x58] sm:$0xff] %v231_v41 }
 0x10e   :  { %v268_v42 = vpop.f32.mrb[4].mxu0  ;;  %v311_v43 = vpop.f32.mrb[4].mxu1 }
 0x10f   :  { %324 = vst [vmem:[#allocation7 + $0x20] sm:$0xff] %v268_v42  ;;  %v270_v44 = vpop.f32.mrb[5].mxu0  ;;  %326 = vst [vmem:[#allocation7 + $0x30] sm:$0xff] %v311_v43  ;;  %v313_v45 = vpop.f32.mrb[5].mxu1 }
 0x110   :  { %325 = vst [vmem:[#allocation7 + $0x28] sm:$0xff] %v270_v44  ;;  %v272_v46 = vpop.f32.mrb[6].mxu0  ;;  %327 = vst [vmem:[#allocation7 + $0x38] sm:$0xff] %v313_v45  ;;  %v315_v47 = vpop.f32.mrb[6].mxu1 }
 0x111   :  { %332 = vst [vmem:[#allocation7 + $0x60] sm:$0xff] %v272_v46  ;;  %v274_v48 = vpop.f32.mrb[7].mxu0  ;;  %334 = vst [vmem:[#allocation7 + $0x70] sm:$0xff] %v315_v47  ;;  %v317_v49 = vpop.f32.mrb[7].mxu1 }
 0x112   :  { %333 = vst [vmem:[#allocation7 + $0x68] sm:$0xff] %v274_v48  ;;  %335 = vst [vmem:[#allocation7 + $0x78] sm:$0xff] %v317_v49 }
 0x113   :  { %440 = shalt.err (!%p437_p6)
}
 0x114   :  { %s441_s12 = scalar_lea.hbm %s526_s2, 2048 }
 0x115   :  { %p442_p7 = scmp.ne.s32.totalorder %s526_s2, %s441_s12  ;;  %p445_p8 = scmp.lt.u32.totalorder %s441_s12, %s526_s2 }
 0x117   :  { %p447_p9 = pnand %p445_p8, %p442_p7 }
 0x119   :  { %450 = shalt.err (!%p447_p9)
}
 0x11a   :  { %s465_s17 = smov 1024  }
 0x11b   :  { %347 = dma.vmem_to_hbm [thread:$0]  %s342_s8, 2048, %s526_s2, [#allocation4], %s465_s17, %s465_s17, %s458_s19  }
 0x11c   :  { %455 = dma.done.wait [#allocation4], 2048  }
 0x11d   :  { %456 = vsyncadd [#allocation4], 4294965248 }
 0x11e   :  { %351 = vsyncpa [#allocation3], 1 }
 0x11f   :  { %352 = vsyncpa [#allocation6], 1 }
 0x120   :  { %353 = vsyncpa [#allocation4], 1 }

</bundles_post_ra>
